<compile_context>
chip_gen: v5e
topology: v5e:2x2
jax: 0.10.0
libtpu: 0.0.40
codegen_flags: <defaults>
</compile_context>

<pallas_src>
import numpy as np
import jax
import jax.numpy as jnp
from jax.experimental import pallas as pl
from jax.experimental.pallas import tpu as pltpu


_MAX_TB = 512           # rows per batch tile (diminishing returns past ~512)
_MIN_GRID_STEPS = 4     # >=2 grid steps per TensorCore on v7x (2 TCs)
_MIN_TB = 256           # don't shrink batch tiles below this (per-step overhead)


def _vmem_capacity_bytes():
    """Per-core VMEM capacity; conservative fallback if the query is unavailable."""
    try:
        cap = getattr(pltpu.get_tpu_info(), "vmem_capacity_bytes", None)
        if cap:
            return int(cap)
    except Exception:
        pass
    return 64 * 1024 * 1024  # v7x per-TensorCore capacity (smallest current gen)


def _row_align(dtype):
    # f32 packs 8 rows per vreg sublane group; bf16 packs 16.
    return 16 if jnp.dtype(dtype).itemsize == 2 else 8


def _choose_tile_and_limit(B, C, x_dtype, p_itemsize):
    """Pick the batch tile TB and an explicit scoped-VMEM limit."""
    cap = _vmem_capacity_bytes()
    budget = int(0.65 * cap)                      # generation-aware working-set budget
    align = _row_align(x_dtype)
    x_itemsize = jnp.dtype(x_dtype).itemsize

    p_bytes = C * C * p_itemsize                  # P: grid-invariant, single-buffered
    per_row = 2 * 2 * C * x_itemsize              # x + out rows, double-buffered

    avail = budget - p_bytes
    if avail >= _MIN_TB * per_row:
        tb = avail // per_row
    else:
        # TODO(synk): for very large C (P alone near the VMEM budget) switch to
        # an N/K-tiled matmul with an f32 accumulator scratch instead of tiny
        # batch tiles; until then keep the tile MXU-friendly and raise the limit.
        tb = _MIN_TB
    tb = max(align, min(_MAX_TB, (tb // align) * align))

    if B <= tb:
        tb = B                                    # single block == full dim (always legal)
    else:
        # Keep >=_MIN_GRID_STEPS grid steps for large B so v7x's two TensorCores
        # each see >=2 steps (pipelined DMA); never shrink tiles below _MIN_TB.
        overlap_tb = ((B // _MIN_GRID_STEPS) // align) * align
        if overlap_tb >= _MIN_TB:
            tb = min(tb, overlap_tb)

    plan_bytes = p_bytes + 2 * tb * 2 * C * x_itemsize
    vmem_limit = int(min(cap, max(plan_bytes + (8 << 20), 32 << 20)))
    return tb, vmem_limit


# ----------------------------------------------------------------------------
# Pallas kernel: out = x @ P   (P is a one-hot permutation matrix)
# ----------------------------------------------------------------------------
def _permute_matmul_kernel(x_ref, p_ref, o_ref):
    x = x_ref[...]
    # bf16 {0,1} casts exactly to any float dtype; the cast lives in VMEM only.
    p = p_ref[...].astype(x.dtype)
    # Pin HIGHEST precision for f32 inputs so the multi-pass MXU decomposition
    # reconstructs x * 1.0 exactly on every generation (v7x has no native f32).
    # bf16 inputs use the native single pass (precision is a no-op there).
    prec = (jax.lax.Precision.HIGHEST
            if x.dtype == jnp.dtype(jnp.float32) else jax.lax.Precision.DEFAULT)
    o_ref[...] = jnp.dot(
        x, p, precision=prec, preferred_element_type=jnp.float32
    ).astype(o_ref.dtype)


@jax.jit
def _apply_permutation(x, p_onehot):
    """x: [B, C]; p_onehot: [C, C] bf16 one-hot permutation matrix."""
    B, C = x.shape
    tb, vmem_limit = _choose_tile_and_limit(B, C, x.dtype, p_onehot.dtype.itemsize)
    grid = (pl.cdiv(B, tb),)

    return pl.pallas_call(
        _permute_matmul_kernel,
        out_shape=jax.ShapeDtypeStruct((B, C), x.dtype),
        grid_spec=pltpu.PrefetchScalarGridSpec(
            num_scalar_prefetch=0,
            grid=grid,
            in_specs=[
                # x: one batch tile per grid step (double-buffered, pipelined).
                pl.BlockSpec((tb, C), lambda i: (i, 0)),
                # P: grid-invariant block, single-buffered -> half the VMEM.
                pl.BlockSpec((C, C), lambda i: (0, 0),
                             pipeline_mode=pl.Buffered(1)),
            ],
            out_specs=pl.BlockSpec((tb, C), lambda i: (i, 0)),
        ),
        compiler_params=pltpu.CompilerParams(
            # Batch tiles are independent -> shard across v7x's 2 TensorCores.
            dimension_semantics=("parallel",),
            vmem_limit_bytes=vmem_limit,
        ),
        cost_estimate=pl.CostEstimate(
            flops=2 * B * C * C,
            transcendentals=0,
            bytes_accessed=2 * B * C * x.dtype.itemsize
            + C * C * p_onehot.dtype.itemsize,
        ),
    )(x, p_onehot)


# ----------------------------------------------------------------------------
# Module-equivalent wrapper
# ----------------------------------------------------------------------------
class Permute2d:
    """JAX/Pallas port of glow.modules.Permute2d (static channel permutation)."""

    def __init__(self, num_channels, shuffle, seed=0):
        self.num_channels = int(num_channels)
        self.indices = np.arange(self.num_channels).astype(np.int64)
        self.indices_inverse = np.zeros(self.num_channels, dtype=np.int64)
        for i in range(self.num_channels):
            self.indices_inverse[self.indices[i]] = i
        self._rng = np.random.RandomState(seed)
        if shuffle:
            self.reset_indices()
        else:
            self._rebuild_perm_matrices()

    def reset_indices(self):
        self._rng.shuffle(self.indices)
        for i in range(self.num_channels):
            self.indices_inverse[self.indices[i]] = i
        self._rebuild_perm_matrices()

    def _rebuild_perm_matrices(self):
        C = self.num_channels
        # (x @ P)[:, j] = x[:, idx[j]]  <=>  P[idx[j], j] = 1.
        p_fwd = np.zeros((C, C), dtype=np.float32)
        p_fwd[self.indices, np.arange(C)] = 1.0
        p_inv = np.zeros((C, C), dtype=np.float32)
        p_inv[self.indices_inverse, np.arange(C)] = 1.0
        # bf16 is exact for {0,1}; halves P's HBM traffic and VMEM footprint.
        self.P_fwd = jnp.asarray(p_fwd, dtype=jnp.bfloat16)
        self.P_inv = jnp.asarray(p_inv, dtype=jnp.bfloat16)

    def __call__(self, x, reverse=False):
        assert x.ndim == 2
        if x.dtype not in (jnp.dtype(jnp.float32), jnp.dtype(jnp.bfloat16)):
            # Exact for any dtype (ints, etc.): plain XLA gather, like index_select.
            idx = self.indices_inverse if reverse else self.indices
            return x[:, jnp.asarray(idx)]
        p = self.P_inv if reverse else self.P_fwd
        return _apply_permutation(x, p)


# ----------------------------------------------------------------------------
# Demo / correctness check
# ----------------------------------------------------------------------------
if __name__ == "__main__":
    root = jax.random.PRNGKey(0)
    k1, k2 = jax.random.split(root)

    # Case 1: small, non-lane-aligned channels (sub-128 output tail), f32.
    B, C = 8, 32
    x = jax.random.normal(k1, (B, C), dtype=jnp.float32)
    mod = Permute2d(num_channels=C, shuffle=True, seed=0)
    y = jax.block_until_ready(mod(x, reverse=False))
    y_ref = x[:, jnp.asarray(mod.indices)]
    assert y.shape == (B, C) and y.dtype == x.dtype
    assert jnp.allclose(y, y_ref), "forward permutation mismatch"
    x_rec = jax.block_until_ready(mod(y, reverse=True))
    assert jnp.allclose(x_rec, x), "inverse permutation did not recover input"

    # Case 2: lane-aligned channels, bf16 inputs (16-row tile alignment path).
    B2, C2 = 64, 128
    x2 = jax.random.normal(k2, (B2, C2), dtype=jnp.bfloat16)
    mod2 = Permute2d(num_channels=C2, shuffle=True, seed=1)
    y2 = jax.block_until_ready(mod2(x2, reverse=False))
    y2_ref = x2[:, jnp.asarray(mod2.indices)]
    assert y2.shape == (B2, C2) and y2.dtype == x2.dtype
    assert jnp.array_equal(y2, y2_ref), "bf16 forward permutation mismatch"
    x2_rec = jax.block_until_ready(mod2(y2, reverse=True))
    assert jnp.array_equal(x2_rec, x2), "bf16 inverse mismatch"

    print("KERNEL_OK")
</pallas_src>

<mosaic_0001>
module attributes {stable_mosaic.version = 11 : i64} {
  func.func @_permute_matmul_kernel(%arg0: i32, %arg1: memref<8x32xf32, #tpu.memory_space<vmem>>, %arg2: memref<32x32xbf16, #tpu.memory_space<vmem>>, %arg3: memref<8x32xf32, #tpu.memory_space<vmem>>) attributes {dimension_semantics = [#tpu.dimension_semantics<parallel>], iteration_bounds = array<i64: 1>, scalar_prefetch = 0 : i64, scratch_operands = 0 : i64, tpu.core_type = #tpu.core_type<tc>, window_params = [{transform_indices = @transform_0, window_bounds = array<i64: 8, 32>}, {pipeline_mode = #tpu.pipeline_mode<synchronous>, transform_indices = @transform_1, window_bounds = array<i64: 32, 32>}, {transform_indices = @transform_2, window_bounds = array<i64: 8, 32>}]} {
    %c0 = arith.constant 0 : index
    %c0_0 = arith.constant 0 : index
    %0 = vector.load %arg1[%c0, %c0_0] : memref<8x32xf32, #tpu.memory_space<vmem>>, vector<8x32xf32>
    %c0_1 = arith.constant 0 : index
    %c0_2 = arith.constant 0 : index
    %1 = vector.load %arg2[%c0_1, %c0_2] : memref<32x32xbf16, #tpu.memory_space<vmem>>, vector<32x32xbf16>
    %2 = arith.extf %1 : vector<32x32xbf16> to vector<32x32xf32>
    %cst = arith.constant dense<0.000000e+00> : vector<8x32xf32>
    %3 = tpu.matmul %0, %2, %cst {dimension_numbers = #tpu.dot_dimension_numbers<[1], [0], [0], [1], [0, 0, 1, 1], [], []>, precision = #tpu.contract_precision<fp32>} : vector<8x32xf32>, vector<32x32xf32>, vector<8x32xf32> -> vector<8x32xf32>
    %c0_3 = arith.constant 0 : index
    %c0_4 = arith.constant 0 : index
    %4 = vector.load %arg3[%c0_3, %c0_4] : memref<8x32xf32, #tpu.memory_space<vmem>>, vector<8x32xf32>
    tpu.vector_store %arg3[%c0_3, %c0_4], %3 {strides = array<i32>} : memref<8x32xf32, #tpu.memory_space<vmem>>, vector<8x32xf32>,
    return
  }
  func.func @transform_0(%arg0: i32) -> (i32, i32) {
    %c0_i32 = arith.constant 0 : i32
    %c0_i32_0 = arith.constant 0 : i32
    return %arg0, %c0_i32 : i32, i32
  }
  func.func @transform_1(%arg0: i32) -> (i32, i32) {
    %c0_i32 = arith.constant 0 : i32
    %c0_i32_0 = arith.constant 0 : i32
    %c0_i32_1 = arith.constant 0 : i32
    return %c0_i32, %c0_i32_0 : i32, i32
  }
  func.func @transform_2(%arg0: i32) -> (i32, i32) {
    %c0_i32 = arith.constant 0 : i32
    %c0_i32_0 = arith.constant 0 : i32
    return %arg0, %c0_i32 : i32, i32
  }
}

</mosaic_0001>

<bundles_post_ra>
// kernel: _apply_permutation.1
= control target key start
LH: loop header
LB: loop body
LE: loop exit
PB: predicated region body
PF: predicated region fallthrough
CT: control target
= control target key end

     0   :  { %7 = vsyncpa [#allocation3], 0  ;;  %s358_s0 = inlined_call_operand.hbm [shape: f32[8,32], index: 0, kind: input, shape index: {}]   ;;  %s359_s1 = inlined_call_operand.hbm [shape: bf16[32,32], index: 1, kind: input, shape index: {}]   ;;  %s360_s2 = inlined_call_operand.hbm [shape: f32[8,32], index: 2, kind: output, shape index: {}]  }
   0x1   :  { %8 = vsyncpa [#allocation6], 0 }
   0x2   :  { %9 = vsyncpa [#allocation4], 0  ;;  %s15_s11 = sshll.u32 %s358_s0, 4  ;;  %s327_s12 = smov [#allocation2]   ;;  %s16_s11 = int_to_ptr.hbm [resolvable:$true] %s15_s11 }
   0x3   :  { %s17_s13 = sshll.u32 %s327_s12, 4  ;;  %s25_s16 = sshll.u32 %s359_s1, 4  ;;  %s18_s13 = int_to_ptr.vmem [resolvable:$true] %s17_s13  ;;  %s26_s16 = int_to_ptr.hbm [resolvable:$true] %s25_s16 }
   0x4   :  { %20 = dma.hbm_to_vmem [thread:$0]  %s16_s11, 128, %s18_s13, [#allocation3]  }
   0x5   :  { %s328_s17 = smov [#allocation5]   ;;  %s329_s19 = smov 64  }
   0x6   :  { %s27_s18 = sshll.u32 %s328_s17, 4  ;;  %s330_s20 = smov 4   ;;  %s28_s18 = int_to_ptr.vmem [resolvable:$true] %s27_s18 }
   0x7   :  { %33 = dma.hbm_to_vmem [thread:$0]  %s26_s16, 256, %s28_s18, [#allocation6], %s329_s19, %s329_s19, %s330_s20  }
   0x8   :  { %321 = dma.done.wait [#allocation3], 128  }
   0x9   :  { %322 = vsyncadd [#allocation3], 4294967168 }
   0xa   :  { %323 = dma.done.wait [#allocation6], 256  }
   0xb   :  { %324 = vsyncadd [#allocation6], 4294967040  ;;  %vm51_vm0 = vcmask 261120   ;;  %v243_v0 = vld [vmem:[#allocation5 + $0x8] sm:$0xff]   ;;  %v236_v1 = vld [vmem:[#allocation5] sm:$0xff]   ;;  %s331_s0 = smov [#allocation7]  }
   0xc   :  { %v42_v2 = vld [vmem:[#allocation2] sm:$0xff]  ;;  %v242_v3 = vunpack.c.h.bf16 %v243_v0  ;;  %v241_v4 = vunpack.c.l.bf16 %v243_v0  ;;  %v238_v5 = vunpack.c.h.bf16 %v236_v1  ;;  %v237_v6 = vunpack.c.l.bf16 %v236_v1  ;;  %s222_s1 = sshll.u32 %s331_s0, 4  ;;  %s224_s23 = sshll.u32 %s360_s2, 4  ;;  %s223_s1 = int_to_ptr.vmem [resolvable:$true] %s222_s1  ;;  %s225_s23 = int_to_ptr.hbm [resolvable:$true] %s224_s23 }
   0xd   :  { %v53_v7 = vsel %vm51_vm0, %v42_v2, 0 }
   0xe   :  { %v92_v8 = vsub.f32 %v242_v3, %v242_v3  ;;  %67 = vmatpush.msra.mxu0 %v242_v3  ;;  %v97_v9 = vsub.f32 %v241_v4, %v241_v4  ;;  %155 = vmatpush.msra.mxu3 %v242_v3  ;;  %v102_v10 = vsub.f32 %v238_v5, %v238_v5  ;;  %v71_v11 = vand.u32 4294901760, %v53_v7 }
   0xf   :  { %v107_v12 = vsub.f32 %v237_v6, %v237_v6 }
  0x10   :  { %130 = vmatpush.msra.mxu2 %v92_v8  ;;  %68 = vmatpush.msra.mxu0 %v241_v4  ;;  %v93_v13 = vand.u32 4294901760, %v92_v8  ;;  %v98_v14 = vand.u32 4294901760, %v97_v9  ;;  %v72_v15 = vsub.f32 %v53_v7, %v71_v11  ;;  %v103_v16 = vand.u32 4294901760, %v102_v10 }
  0x11   :  { %156 = vmatpush.msra.mxu3 %v241_v4  ;;  %v108_v17 = vand.u32 4294901760, %v107_v12 }
  0x12   :  { %132 = vmatpush.msra.mxu2 %v97_v9  ;;  %v94_v18 = vsub.f32 %v92_v8, %v93_v13  ;;  %69 = vmatpush.msra.mxu0 %v238_v5  ;;  %v99_v19 = vsub.f32 %v97_v9, %v98_v14  ;;  %v104_v20 = vsub.f32 %v102_v10, %v103_v16  ;;  %v73_v21 = vand.u32 4294901760, %v72_v15 }
  0x13   :  { %157 = vmatpush.msra.mxu3 %v238_v5  ;;  %v109_v25 = vsub.f32 %v107_v12, %v108_v17 }
  0x14   :  { %v95_v22 = vand.u32 4294901760, %v94_v18  ;;  %134 = vmatpush.msra.mxu2 %v102_v10  ;;  %v100_v23 = vand.u32 4294901760, %v99_v19  ;;  %70 = vmatpush.msra.mxu0 %v237_v6  ;;  %v74_v24 = vsub.f32 %v72_v15, %v73_v21  ;;  %v105_v26 = vand.u32 4294901760, %v104_v20 }
  0x15   :  { %158 = vmatpush.msra.mxu3 %v237_v6  ;;  %v110_v28 = vand.u32 4294901760, %v109_v25 }
  0x16   :  { %180 = vmatpush.msrb.mxu0 %v93_v13  ;;  %96 = vmatpush.msra.mxu1 %v95_v22  ;;  %v75_v27 = vand.u32 4294901760, %v74_v24 }
  0x17   :  { %136 = vmatpush.msra.mxu2 %v107_v12  ;;  %162 = vmatmul.f32.vlgmr.msra.gmra.mxu3 %v73_v21 }
  0x18   :  { %139 = vmatmul.f32.vlgmr.msra.gmra.mxu2 %v72_v15  ;;  %101 = vmatpush.msra.mxu1 %v100_v23 }
  0x19   :  { %76 = vmatmul.f32.vlgmr.msra.gmra.mxu0 %v75_v27 }
  0x1a   :  { %183 = vmatpush.msrb.mxu0 %v98_v14  ;;  %106 = vmatpush.msra.mxu1 %v105_v26 }
  0x1c   :  { %186 = vmatpush.msrb.mxu0 %v103_v16  ;;  %111 = vmatpush.msra.mxu1 %v110_v28 }
  0x1d   :  { %113 = vmatmul.f32.vlgmr.msra.gmra.mxu1 %v71_v11 }
  0x1e   :  { %189 = vmatpush.msrb.mxu0 %v108_v17  ;;  %207 = vmatpush.msrb.mxu1 %v242_v3 }
  0x20   :  { %208 = vmatpush.msrb.mxu1 %v241_v4 }
  0x21   :  { %191 = vmatmul.f32.vlgmr.msrb.gmra.mxu0 %v71_v11 }
  0x22   :  { %209 = vmatpush.msrb.mxu1 %v238_v5 }
  0x24   :  { %210 = vmatpush.msrb.mxu1 %v237_v6 }
  0x25   :  { %212 = vmatmul.f32.vlgmr.msrb.gmra.mxu1 %v71_v11 }
  0x96   :  { %v77_v29 = vpop.f32.mrf.mxu0 }
  0x9a   :  { %v114_v30 = vpop.f32.mrf.mxu1  ;;  %v163_v33 = vpop.f32.mrf.mxu3 }
  0x9b   :  { %v140_v31 = vpop.f32.mrf.mxu2  ;;  %v115_v32 = vadd.f32 %v114_v30, %v77_v29 }
  0x9d   :  { %v141_v34 = vadd.f32 %v140_v31, %v115_v32 }
  0x9e   :  { %v192_v35 = vpop.f32.mrf.mxu0 }
  0x9f   :  { %v164_v36 = vadd.f32 %v163_v33, %v141_v34 }
  0xa1   :  { %v193_v37 = vadd.f32 %v192_v35, %v164_v36 }
  0xa2   :  { %v213_v38 = vpop.f32.mrf.mxu1 }
  0xa3   :  { %v214_v39 = vadd.f32 %v213_v38, %v193_v37 }
  0xa5   :  { %216 = vst.msk [vmem:[#allocation7] sm:$0xff] %vm51_vm0, %v214_v39 }
  0xa6   :  { %227 = dma.vmem_to_hbm [thread:$0]  %s223_s1, 128, %s225_s23, [#allocation4]  }
  0xa7   :  { %325 = dma.done.wait [#allocation4], 128  }
  0xa8   :  { %326 = vsyncadd [#allocation4], 4294967168 }
  0xa9   :  { %232 = vsyncpa [#allocation3], 1 }
  0xaa   :  { %233 = vsyncpa [#allocation6], 1 }
  0xab   :  { %234 = vsyncpa [#allocation4], 1 }

</bundles_post_ra>
